<compile_context>
chip_gen: v6e
topology: v6e:2x2x1
jax: 0.10.0
libtpu: 0.0.40
codegen_flags: <defaults>
</compile_context>

<pallas_src>
import functools

import jax
import jax.numpy as jnp
from jax.experimental import pallas as pl
from jax.experimental.pallas import tpu as pltpu

_EPS = 1e-8


def _row_dot_f32(a, b):
    # Elementwise product in the input dtype (bf16 VALU native on v6e/v7x),
    # lane reduction accumulated in f32 (XLU).
    return jnp.sum((a * b).astype(jnp.float32), axis=-1, keepdims=True)


def _sym_neg_cos_kernel(p0_ref, z1_ref, p1_ref, z0_ref, o_ref, *,
                        batch, tile_b, need_mask):
    p0 = p0_ref[...]
    z1 = z1_ref[...]
    p1 = p1_ref[...]
    z0 = z0_ref[...]

    def cos_rows(x, y):
        w12 = _row_dot_f32(x, y)                              # [TB, 1] f32
        # Per-norm clamp (matches current ATen cosine_similarity); rsqrt goes
        # to the EUP slot, keeping the VPU free for the streaming multiplies.
        inv_nx = jax.lax.rsqrt(jnp.maximum(_row_dot_f32(x, x), _EPS * _EPS))
        inv_ny = jax.lax.rsqrt(jnp.maximum(_row_dot_f32(y, y), _EPS * _EPS))
        return w12 * inv_nx * inv_ny

    cos = cos_rows(p0, z1) + cos_rows(p1, z0)                 # [TB, 1] f32

    if need_mask:
        # Ragged last block: zero rows past the true batch size (garbage rows
        # may be NaN/inf, but jnp.where only selects, so they do not leak).
        i = pl.program_id(0)
        row = jax.lax.broadcasted_iota(jnp.int32, cos.shape, 0) + i * tile_b
        cos = jnp.where(row < batch, cos, 0.0)

    partial = jnp.sum(cos)                                    # scalar f32
    # Lane-dense per-block partial (unmasked vst); only [0, 0] is consumed.
    o_ref[...] = jnp.full(o_ref.shape, partial, dtype=jnp.float32)


def sym_neg_cosine_similarity_loss(out0, out1, *,
                                   vmem_bytes_per_buffer=3 * 1024 * 1024):
    """out0 = (z0, p0), out1 = (z1, p1); each tensor is [B, D]. Returns scalar loss.

    Forward-only.  # TODO(synk): the PyTorch module detaches z0/z1; the
    stop_gradient below documents that, but a custom_vjp would be needed for
    exact SimSiam gradients through this pallas_call.
    """
    z0, p0 = out0
    z1, p1 = out1
    z0 = jax.lax.stop_gradient(z0)
    z1 = jax.lax.stop_gradient(z1)
    assert z0.shape == p0.shape == z1.shape == p1.shape
    B, D = p0.shape

    # --- choose the batch tile from a per-buffer VMEM budget -----------------
    itemsize = jnp.dtype(p0.dtype).itemsize
    bytes_per_row = D * itemsize
    tb = (vmem_bytes_per_buffer // bytes_per_row) // 32 * 32   # 32 covers all dtypes
    tb = int(max(32, min(2048, tb)))
    if B <= tb:
        tile_b = B              # single block: block_shape == full array dim is legal
        need_mask = False
    else:
        tile_b = tb
        need_mask = (B % tile_b) != 0
    grid_b = pl.cdiv(B, tile_b)
    # TODO(synk): for very large D (row tiles no longer fit the VMEM budget),
    # add an inner "arbitrary" reduction axis over D with VMEM scratch partials.

    # Derive the Mosaic VMEM limit from what this launch actually needs:
    # 4 inputs x 2 pipeline buffers x tile + double-buffered output + margin.
    tile_bytes = tile_b * D * itemsize
    vmem_limit = int(max(16 * 1024 * 1024,
                         8 * tile_bytes + 2 * 8 * 128 * 4 + (1 << 20)))

    in_spec = pl.BlockSpec((tile_b, D), lambda i: (i, 0))
    out_spec = pl.BlockSpec((1, 8, 128), lambda i: (i, 0, 0))

    kernel = functools.partial(
        _sym_neg_cos_kernel, batch=B, tile_b=tile_b, need_mask=need_mask)

    partials = pl.pallas_call(
        kernel,
        out_shape=jax.ShapeDtypeStruct((grid_b, 8, 128), jnp.float32),
        grid_spec=pltpu.PrefetchScalarGridSpec(
            num_scalar_prefetch=0,
            grid=(grid_b,),
            in_specs=[in_spec, in_spec, in_spec, in_spec],
            out_specs=out_spec,
        ),
        compiler_params=pltpu.CompilerParams(
            dimension_semantics=("parallel",),
            vmem_limit_bytes=vmem_limit,
        ),
    )(p0, z1, p1, z0)

    # Tiny final reduction + normalization in plain XLA.
    total = jnp.sum(partials[:, 0, 0])
    return (-0.5) * total / B


def _reference(out0, out1):
    z0, p0 = out0
    z1, p1 = out1

    def neg_cos(x, y):
        x = x.astype(jnp.float32)
        y = y.astype(jnp.float32)
        w12 = jnp.sum(x * y, axis=-1)
        nx = jnp.maximum(jnp.sqrt(jnp.sum(x * x, axis=-1)), _EPS)
        ny = jnp.maximum(jnp.sqrt(jnp.sum(y * y, axis=-1)), _EPS)
        return -jnp.mean(w12 / (nx * ny))

    return 0.5 * neg_cos(p0, z1) + 0.5 * neg_cos(p1, z0)


if __name__ == "__main__":
    key = jax.random.PRNGKey(0)

    # Case 1: small SimSiam-style projection/prediction outputs (single block).
    B, D = 8, 128
    k0, k1, k2, k3 = jax.random.split(key, 4)
    z0 = jax.random.normal(k0, (B, D), dtype=jnp.float32)
    p0 = jax.random.normal(k1, (B, D), dtype=jnp.float32)
    z1 = jax.random.normal(k2, (B, D), dtype=jnp.float32)
    p1 = jax.random.normal(k3, (B, D), dtype=jnp.float32)

    loss = sym_neg_cosine_similarity_loss((z0, p0), (z1, p1))
    loss = jax.block_until_ready(loss)
    ref = _reference((z0, p0), (z1, p1))
    assert jnp.allclose(loss, ref, atol=1e-5, rtol=1e-5), (loss, ref)

    # Case 2: force the tiled + ragged-masked path (grid=2, last block partial)
    # by shrinking the per-buffer budget so TB=32 with B=40.
    B2, D2 = 40, 256
    k4, k5, k6, k7 = jax.random.split(jax.random.PRNGKey(1), 4)
    z0b = jax.random.normal(k4, (B2, D2), dtype=jnp.float32)
    p0b = jax.random.normal(k5, (B2, D2), dtype=jnp.float32)
    z1b = jax.random.normal(k6, (B2, D2), dtype=jnp.float32)
    p1b = jax.random.normal(k7, (B2, D2), dtype=jnp.float32)

    loss2 = sym_neg_cosine_similarity_loss(
        (z0b, p0b), (z1b, p1b), vmem_bytes_per_buffer=32 * D2 * 4)
    loss2 = jax.block_until_ready(loss2)
    ref2 = _reference((z0b, p0b), (z1b, p1b))
    assert jnp.allclose(loss2, ref2, atol=1e-5, rtol=1e-5), (loss2, ref2)

    # Case 3: bf16 inputs (native VALU on v6e/v7x), f32 accumulation in-kernel.
    B3, D3 = 16, 512
    k8, k9, k10, k11 = jax.random.split(jax.random.PRNGKey(2), 4)
    z0c = jax.random.normal(k8, (B3, D3), dtype=jnp.bfloat16)
    p0c = jax.random.normal(k9, (B3, D3), dtype=jnp.bfloat16)
    z1c = jax.random.normal(k10, (B3, D3), dtype=jnp.bfloat16)
    p1c = jax.random.normal(k11, (B3, D3), dtype=jnp.bfloat16)

    loss3 = sym_neg_cosine_similarity_loss((z0c, p0c), (z1c, p1c))
    loss3 = jax.block_until_ready(loss3)
    ref3 = _reference((z0c, p0c), (z1c, p1c))
    assert jnp.allclose(jnp.float32(loss3), ref3, atol=2e-2), (loss3, ref3)

    print("KERNEL_OK")
</pallas_src>

<mosaic_0001>
module attributes {stable_mosaic.version = 11 : i64} {
  func.func @_sym_neg_cos_kernel(%arg0: i32, %arg1: memref<8x128xf32, #tpu.memory_space<vmem>>, %arg2: memref<8x128xf32, #tpu.memory_space<vmem>>, %arg3: memref<8x128xf32, #tpu.memory_space<vmem>>, %arg4: memref<8x128xf32, #tpu.memory_space<vmem>>, %arg5: memref<1x8x128xf32, #tpu.memory_space<vmem>>) attributes {dimension_semantics = [#tpu.dimension_semantics<parallel>], iteration_bounds = array<i64: 1>, scalar_prefetch = 0 : i64, scratch_operands = 0 : i64, tpu.core_type = #tpu.core_type<tc>, window_params = [{transform_indices = @transform_0, window_bounds = array<i64: 8, 128>}, {transform_indices = @transform_1, window_bounds = array<i64: 8, 128>}, {transform_indices = @transform_2, window_bounds = array<i64: 8, 128>}, {transform_indices = @transform_3, window_bounds = array<i64: 8, 128>}, {transform_indices = @transform_4, window_bounds = array<i64: 1, 8, 128>}]} {
    %c0 = arith.constant 0 : index
    %c0_0 = arith.constant 0 : index
    %0 = vector.load %arg1[%c0, %c0_0] : memref<8x128xf32, #tpu.memory_space<vmem>>, vector<8x128xf32>
    %c0_1 = arith.constant 0 : index
    %c0_2 = arith.constant 0 : index
    %1 = vector.load %arg2[%c0_1, %c0_2] : memref<8x128xf32, #tpu.memory_space<vmem>>, vector<8x128xf32>
    %c0_3 = arith.constant 0 : index
    %c0_4 = arith.constant 0 : index
    %2 = vector.load %arg3[%c0_3, %c0_4] : memref<8x128xf32, #tpu.memory_space<vmem>>, vector<8x128xf32>
    %c0_5 = arith.constant 0 : index
    %c0_6 = arith.constant 0 : index
    %3 = vector.load %arg4[%c0_5, %c0_6] : memref<8x128xf32, #tpu.memory_space<vmem>>, vector<8x128xf32>
    %4 = arith.mulf %0, %1 : vector<8x128xf32>
    %cst = arith.constant dense<0.000000e+00> : vector<8xf32>
    %5 = vector.multi_reduction <add>, %4, %cst [1] : vector<8x128xf32> to vector<8xf32>
    %6 = vector.shape_cast %5 : vector<8xf32> to vector<8x1xf32>
    %7 = arith.mulf %0, %0 : vector<8x128xf32>
    %cst_7 = arith.constant dense<0.000000e+00> : vector<8xf32>
    %8 = vector.multi_reduction <add>, %7, %cst_7 [1] : vector<8x128xf32> to vector<8xf32>
    %9 = vector.shape_cast %8 : vector<8xf32> to vector<8x1xf32>
    %cst_8 = arith.constant 1.000000e-16 : f32
    %10 = vector.broadcast %cst_8 : f32 to vector<8x1xf32>
    %11 = arith.maximumf %9, %10 : vector<8x1xf32>
    %12 = math.rsqrt %11 : vector<8x1xf32>
    %13 = arith.mulf %1, %1 : vector<8x128xf32>
    %cst_9 = arith.constant dense<0.000000e+00> : vector<8xf32>
    %14 = vector.multi_reduction <add>, %13, %cst_9 [1] : vector<8x128xf32> to vector<8xf32>
    %15 = vector.shape_cast %14 : vector<8xf32> to vector<8x1xf32>
    %cst_10 = arith.constant 1.000000e-16 : f32
    %16 = vector.broadcast %cst_10 : f32 to vector<8x1xf32>
    %17 = arith.maximumf %15, %16 : vector<8x1xf32>
    %18 = math.rsqrt %17 : vector<8x1xf32>
    %19 = arith.mulf %6, %12 : vector<8x1xf32>
    %20 = arith.mulf %19, %18 : vector<8x1xf32>
    %21 = arith.mulf %2, %3 : vector<8x128xf32>
    %cst_11 = arith.constant dense<0.000000e+00> : vector<8xf32>
    %22 = vector.multi_reduction <add>, %21, %cst_11 [1] : vector<8x128xf32> to vector<8xf32>
    %23 = vector.shape_cast %22 : vector<8xf32> to vector<8x1xf32>
    %24 = arith.mulf %2, %2 : vector<8x128xf32>
    %cst_12 = arith.constant dense<0.000000e+00> : vector<8xf32>
    %25 = vector.multi_reduction <add>, %24, %cst_12 [1] : vector<8x128xf32> to vector<8xf32>
    %26 = vector.shape_cast %25 : vector<8xf32> to vector<8x1xf32>
    %cst_13 = arith.constant 1.000000e-16 : f32
    %27 = vector.broadcast %cst_13 : f32 to vector<8x1xf32>
    %28 = arith.maximumf %26, %27 : vector<8x1xf32>
    %29 = math.rsqrt %28 : vector<8x1xf32>
    %30 = arith.mulf %3, %3 : vector<8x128xf32>
    %cst_14 = arith.constant dense<0.000000e+00> : vector<8xf32>
    %31 = vector.multi_reduction <add>, %30, %cst_14 [1] : vector<8x128xf32> to vector<8xf32>
    %32 = vector.shape_cast %31 : vector<8xf32> to vector<8x1xf32>
    %cst_15 = arith.constant 1.000000e-16 : f32
    %33 = vector.broadcast %cst_15 : f32 to vector<8x1xf32>
    %34 = arith.maximumf %32, %33 : vector<8x1xf32>
    %35 = math.rsqrt %34 : vector<8x1xf32>
    %36 = arith.mulf %23, %29 : vector<8x1xf32>
    %37 = arith.mulf %36, %35 : vector<8x1xf32>
    %38 = arith.addf %20, %37 : vector<8x1xf32>
    %39 = vector.shape_cast %38 : vector<8x1xf32> to vector<1x8x1xf32>
    %cst_16 = arith.constant dense<0.000000e+00> : vector<1xf32>
    %40 = vector.multi_reduction <add>, %39, %cst_16 [1, 2] : vector<1x8x1xf32> to vector<1xf32>
    %41 = vector.shape_cast %40 : vector<1xf32> to vector<1x1x1xf32>
    %42 = vector.extract %41[0, 0, 0] : f32 from vector<1x1x1xf32>
    %43 = vector.broadcast %42 : f32 to vector<1x8x128xf32>
    %c0_17 = arith.constant 0 : index
    %c0_18 = arith.constant 0 : index
    %c0_19 = arith.constant 0 : index
    %44 = vector.load %arg5[%c0_17, %c0_18, %c0_19] : memref<1x8x128xf32, #tpu.memory_space<vmem>>, vector<1x8x128xf32>
    tpu.vector_store %arg5[%c0_17, %c0_18, %c0_19], %43 {strides = array<i32>} : memref<1x8x128xf32, #tpu.memory_space<vmem>>, vector<1x8x128xf32>,
    return
  }
  func.func @transform_0(%arg0: i32) -> (i32, i32) {
    %c0_i32 = arith.constant 0 : i32
    %c0_i32_0 = arith.constant 0 : i32
    return %arg0, %c0_i32 : i32, i32
  }
  func.func @transform_1(%arg0: i32) -> (i32, i32) {
    %c0_i32 = arith.constant 0 : i32
    %c0_i32_0 = arith.constant 0 : i32
    return %arg0, %c0_i32 : i32, i32
  }
  func.func @transform_2(%arg0: i32) -> (i32, i32) {
    %c0_i32 = arith.constant 0 : i32
    %c0_i32_0 = arith.constant 0 : i32
    return %arg0, %c0_i32 : i32, i32
  }
  func.func @transform_3(%arg0: i32) -> (i32, i32) {
    %c0_i32 = arith.constant 0 : i32
    %c0_i32_0 = arith.constant 0 : i32
    return %arg0, %c0_i32 : i32, i32
  }
  func.func @transform_4(%arg0: i32) -> (i32, i32, i32) {
    %c0_i32 = arith.constant 0 : i32
    %c0_i32_0 = arith.constant 0 : i32
    %c0_i32_1 = arith.constant 0 : i32
    return %arg0, %c0_i32, %c0_i32_0 : i32, i32, i32
  }
}

</mosaic_0001>

<bundles_post_ra>
// kernel: tpu_custom_call.1
= control target key start
LH: loop header
LB: loop body
LE: loop exit
PB: predicated region body
PF: predicated region fallthrough
CT: control target
= control target key end

     0   :  { %9 = vsyncpa [#allocation3], 0  ;;  %s298_s0 = inlined_call_operand.hbm [shape: f32[8,128], index: 0, kind: input, shape index: {}]   ;;  %s299_s1 = inlined_call_operand.hbm [shape: f32[8,128], index: 1, kind: input, shape index: {}]   ;;  %s300_s2 = inlined_call_operand.hbm [shape: f32[8,128], index: 2, kind: input, shape index: {}]   ;;  %s301_s3 = inlined_call_operand.hbm [shape: f32[8,128], index: 3, kind: input, shape index: {}]   ;;  %s302_s4 = inlined_call_operand.hbm [shape: f32[1,8,128], index: 4, kind: output, shape index: {}]  }
   0x1   :  { %10 = vsyncpa [#allocation6], 0 }
   0x2   :  { %11 = vsyncpa [#allocation9], 0 }
   0x3   :  { %12 = vsyncpa [#allocation4], 0  ;;  %s253_s15 = smov [#allocation5]   ;;  %s254_s17 = smov [#allocation2]  }
   0x4   :  { %s29_s16 = sshll.u32 %s253_s15, 4  ;;  %s19_s18 = sshll.u32 %s254_s17, 4  ;;  %s30_s16 = int_to_ptr.vmem [resolvable:$true] %s29_s16  ;;  %s20_s18 = int_to_ptr.vmem [resolvable:$true] %s19_s18 }
   0x5   :  { %s153_s19 = scalar_lea.vmem %s30_s16, 128  ;;  %p158_p1 = scmp.lt.s32.totalorder %s30_s16, %s30_s16 }
   0x6   :  { %p154_p0 = scmp.ne.s32.totalorder %s30_s16, %s153_s19  ;;  %p159_p2 = scmp.lt.s32.totalorder %s153_s19, %s153_s19 }
   0x8   :  { %p160_p3 = por %p159_p2, %p158_p1 }
   0xa   :  { %p161_p4 = pnand %p160_p3, %p154_p0 }
   0xc   :  { %164 = shalt.err (!%p161_p4)
}
   0xd   :  { %32 = dma.hbm_to_vmem [thread:$0]  %s299_s1, 128, %s30_s16, [#allocation6]  }
   0xe   :  { %s173_s22 = scalar_lea.vmem %s20_s18, 128  ;;  %p178_p6 = scmp.lt.s32.totalorder %s20_s18, %s20_s18 }
   0xf   :  { %p174_p5 = scmp.ne.s32.totalorder %s20_s18, %s173_s22  ;;  %p179_p7 = scmp.lt.s32.totalorder %s173_s22, %s173_s22 }
  0x11   :  { %p180_p8 = por %p179_p7, %p178_p6 }
  0x13   :  { %p181_p9 = pnand %p180_p8, %p174_p5 }
  0x15   :  { %184 = shalt.err (!%p181_p9)
}
  0x16   :  { %22 = dma.hbm_to_vmem [thread:$0]  %s298_s0, 128, %s20_s18, [#allocation3]  }
  0x17   :  { %s255_s25 = smov [#allocation7]   ;;  %s256_s27 = smov [#allocation8]  }
  0x18   :  { %s39_s26 = sshll.u32 %s255_s25, 4  ;;  %s49_s28 = sshll.u32 %s256_s27, 4  ;;  %s40_s26 = int_to_ptr.vmem [resolvable:$true] %s39_s26  ;;  %s50_s28 = int_to_ptr.vmem [resolvable:$true] %s49_s28 }
  0x19   :  { %s193_s29 = scalar_lea.vmem %s40_s26, 128  ;;  %p198_p11 = scmp.lt.s32.totalorder %s40_s26, %s40_s26 }
  0x1a   :  { %p194_p10 = scmp.ne.s32.totalorder %s40_s26, %s193_s29  ;;  %p199_p12 = scmp.lt.s32.totalorder %s193_s29, %s193_s29 }
  0x1c   :  { %p200_p13 = por %p199_p12, %p198_p11 }
  0x1e   :  { %p201_p0 = pnand %p200_p13, %p194_p10 }
  0x20   :  { %204 = shalt.err (!%p201_p0)
}
  0x21   :  { %42 = dma.hbm_to_vmem [thread:$0]  %s300_s2, 128, %s40_s26, [#allocation6]  }
  0x22   :  { %s213_s5 = scalar_lea.vmem %s50_s28, 128  ;;  %p218_p2 = scmp.lt.s32.totalorder %s50_s28, %s50_s28 }
  0x23   :  { %p214_p1 = scmp.ne.s32.totalorder %s50_s28, %s213_s5  ;;  %p219_p3 = scmp.lt.s32.totalorder %s213_s5, %s213_s5 }
  0x25   :  { %p220_p4 = por %p219_p3, %p218_p2 }
  0x27   :  { %p221_p5 = pnand %p220_p4, %p214_p1 }
  0x29   :  { %224 = shalt.err (!%p221_p5)
}
  0x2a   :  { %52 = dma.hbm_to_vmem [thread:$0]  %s301_s3, 128, %s50_s28, [#allocation9]  }
  0x2b   :  { %245 = dma.done.wait [#allocation3], 128  }
  0x2c   :  { %246 = vsyncadd [#allocation3], 4294967168 }
  0x2d   :  { %247 = dma.done.wait [#allocation6], 256  }
  0x2e   :  { %248 = vsyncadd [#allocation6], 4294967040 }
  0x2f   :  { %249 = dma.done.wait [#allocation9], 128  }
  0x30   :  { %250 = vsyncadd [#allocation9], 4294967168  ;;  %v65_v0 = vld [vmem:[#allocation2] sm:$0xff]  ;;  %v66_v1 = vld [vmem:[#allocation5] sm:$0xff]  ;;  %vm100_vm0 = vcmask 7168   ;;  %s257_s2 = smov [#allocation10]  }
  0x31   :  { %v67_v2 = vld [vmem:[#allocation7] sm:$0xff]  ;;  %v72_v3 = vmul.f32 %v65_v0, %v65_v0  ;;  %v77_v4 = vmul.f32 %v66_v1, %v66_v1  ;;  %v68_v5 = vld [vmem:[#allocation8] sm:$0xff]  ;;  %v69_v8 = vmul.f32 %v66_v1, %v65_v0  ;;  %s119_s3 = sshll.u32 %s257_s2, 4  ;;  %s120_s3 = int_to_ptr.vmem [resolvable:$true] %s119_s3 }
  0x32   :  { %v87_v6 = vmul.f32 %v67_v2, %v67_v2  ;;  %v92_v7 = vmul.f32 %v68_v5, %v68_v5  ;;  %v84_v9 = vmul.f32 %v68_v5, %v67_v2  ;;  %s225_s8 = scalar_lea.vmem %s120_s3, 128  ;;  %p230_p7 = scmp.lt.s32.totalorder %s120_s3, %s120_s3 }
  0x33   :  { %73 = vadd.xlane.f32.xlu0 %v72_v3  ;;  %78 = vadd.xlane.f32.xlu1 %v77_v4  ;;  %p226_p6 = scmp.ne.s32.totalorder %s120_s3, %s225_s8  ;;  %p231_p8 = scmp.lt.s32.totalorder %s225_s8, %s225_s8 }
  0x35   :  { %p232_p9 = por %p231_p8, %p230_p7 }
  0x37   :  { %88 = vadd.xlane.f32.xlu0 %v87_v6  ;;  %93 = vadd.xlane.f32.xlu1 %v92_v7  ;;  %p233_p10 = pnand %p232_p9, %p226_p6 }
  0x3b   :  { %70 = vadd.xlane.f32.xlu0 %v69_v8  ;;  %85 = vadd.xlane.f32.xlu1 %v84_v9 }
  0xbc   :  { %v74_v10 = vpop.xlane.xlu0 %73  ;;  %v79_v11 = vpop.xlane.xlu1 %78 }
  0xbd   :  { %v75_v12 = vmax.f32 %v74_v10, 1e-16  ;;  %v80_v13 = vmax.f32 %v79_v11, 1e-16 }
  0xbf   :  { %137 = vrsqrt.f32 %v75_v12 }
  0xc0   :  { %v89_v14 = vpop.xlane.xlu0 %88  ;;  %v94_v15 = vpop.xlane.xlu1 %93  ;;  %139 = vrsqrt.f32 %v80_v13 }
  0xc1   :  { %v90_v16 = vmax.f32 %v89_v14, 1e-16  ;;  %v95_v17 = vmax.f32 %v94_v15, 1e-16 }
  0xc3   :  { %141 = vrsqrt.f32 %v90_v16 }
  0xc4   :  { %143 = vrsqrt.f32 %v95_v17  ;;  %v71_v19 = vpop.xlane.xlu0 %70  ;;  %v86_v20 = vpop.xlane.xlu1 %85 }
  0xcc   :  { %v138_v18 = vpop.eup %137 }
  0xcd   :  { %v140_v21 = vpop.eup %139  ;;  %v82_v22 = vmul.f32 %v138_v18, %v71_v19 }
  0xcf   :  { %v83_v26 = vmul.f32 %v140_v21, %v82_v22 }
  0xd0   :  { %v142_v23 = vpop.eup %141 }
  0xd1   :  { %v144_v24 = vpop.eup %143  ;;  %v97_v25 = vmul.f32 %v142_v23, %v86_v20 }
  0xd3   :  { %v98_v27 = vmul.f32 %v144_v24, %v97_v25 }
  0xd5   :  { %v99_v28 = vadd.f32 %v98_v27, %v83_v26 }
  0xd7   :  { %v101_v29 = vsel %vm100_vm0, %v99_v28, 0.0 }
  0xd8   :  { %102 = vadd.xlane.f32.xlu0 %v101_v29 }
 0x161   :  { %v103_v30 = vpop.xlane.xlu0 %102 }
 0x162   :  { %v104_v31 = vrot.slane %v103_v30, 4 }
 0x164   :  { %v105_v32 = vadd.f32 %v104_v31, %v103_v30 }
 0x166   :  { %v106_v33 = vrot.slane %v105_v32, 2 }
 0x168   :  { %v107_v34 = vadd.f32 %v106_v33, %v105_v32 }
 0x16a   :  { %v108_v35 = vrot.slane %v107_v34, 1 }
 0x16c   :  { %v109_v36 = vadd.f32 %v108_v35, %v107_v34 }
 0x16e   :  { %130 = vpush %v109_v36 }
 0x19f   :  { %s131_s7 = spop %130 }
 0x1a0   :  { %v111_v37 = vstv %s131_s7 }
 0x1a1   :  { %112 = vst [vmem:[#allocation10] sm:$0xff] %v111_v37 }
 0x1a2   :  { %236 = shalt.err (!%p233_p10)
}
 0x1a3   :  { %122 = dma.vmem_to_hbm [thread:$0]  %s120_s3, 128, %s302_s4, [#allocation4]  }
 0x1a4   :  { %251 = dma.done.wait [#allocation4], 128  }
 0x1a5   :  { %252 = vsyncadd [#allocation4], 4294967168 }
 0x1a6   :  { %126 = vsyncpa [#allocation3], 1 }
 0x1a7   :  { %127 = vsyncpa [#allocation6], 1 }
 0x1a8   :  { %128 = vsyncpa [#allocation9], 1 }
 0x1a9   :  { %129 = vsyncpa [#allocation4], 1 }

</bundles_post_ra>
